<compile_context>
chip_gen: v5e
topology: v5e:2x2
jax: 0.10.0
libtpu: 0.0.40
codegen_flags: <defaults>
</compile_context>

<pallas_src>
import functools

import jax
import jax.numpy as jnp
from jax import lax
from jax.experimental import pallas as pl
from jax.experimental.pallas import tpu as pltpu


def _round_up(x: int, m: int) -> int:
    return ((x + m - 1) // m) * m


def _device_kind() -> str:
    try:
        return jax.devices()[0].device_kind.lower()
    except Exception:
        return ""


def _vmem_cap_bytes(kind: str) -> int:
    """Per-generation scoped-VMEM ceiling (physical: v4/v5/v6 128 MiB, v7x 64)."""
    if "v7" in kind:
        return 56 << 20
    if "v2" in kind or "v3" in kind:
        return 12 << 20
    if "v4" in kind or "v5" in kind or "v6" in kind:
        return 100 << 20
    return 64 << 20          # unknown: stay conservative


def _choose_tok(n: int, tok_max: int) -> int:
    """Token-block size: multiple of 8, <= tok_max, and >= 2 blocks when
    possible so the 'parallel' token axis can feed both v7x TensorCores."""
    tok = max(8, min(tok_max, _round_up(n, 8)))
    if n > 8 and _round_up(n, tok) // tok < 2:
        tok = max(8, _round_up((n + 1) // 2, 8))
    return tok


# -----------------------------------------------------------------------------
# Dropout (inverted) on an (R, C) f32 tile.
# -----------------------------------------------------------------------------

def _hash_u32(x):
    """lowbias32 finalizer -- interpret/CPU fallback only."""
    x = x ^ (x >> 16)
    x = x * jnp.uint32(0x7FEB352D)
    x = x ^ (x >> 15)
    x = x * jnp.uint32(0x846CA68B)
    x = x ^ (x >> 16)
    return x


def _apply_dropout(x, dropout_p, seed_scalar, salt0, salt1, use_hw_prng):
    threshold = jnp.uint32(min(int(dropout_p * (2.0 ** 32)), 2 ** 32 - 1))
    if use_hw_prng:
        # Hardware PRNG: nearly free (no full-width u32 hash temporaries).
        pltpu.prng_seed(seed_scalar, salt0, salt1)
        bits = pltpu.prng_random_bits(x.shape)
        if bits.dtype != jnp.uint32:
            bits = pltpu.bitcast(bits, jnp.uint32)
    else:
        # Stateless counter hash (only used off-TPU, e.g. interpret mode).
        base = (seed_scalar.astype(jnp.uint32) * jnp.uint32(0x9E3779B9)
                + salt0.astype(jnp.uint32) * jnp.uint32(0x85EBCA6B)
                + salt1.astype(jnp.uint32) * jnp.uint32(0xC2B2AE35))
        row = lax.broadcasted_iota(jnp.uint32, x.shape, 0)
        col = lax.broadcasted_iota(jnp.uint32, x.shape, 1)
        bits = _hash_u32(base + row * jnp.uint32(x.shape[1]) + col)
    keep = bits >= threshold
    scale = jnp.float32(1.0 / (1.0 - dropout_p))
    return jnp.where(keep, x * scale, jnp.float32(0.0))


# -----------------------------------------------------------------------------
# Path 1 (small tables): fused "two-hot" matmul against a VMEM-resident table.
# -----------------------------------------------------------------------------

def _embedding_matmul_kernel(seed_ref,          # SMEM (scalar prefetch): (1,)
                             idx_ref,           # (TOK, 2) int32: [word, V+pos]
                             tab_ref,           # (ROWS, TH) bf16 [word;pos] tile
                             out_ref,           # (TOK, TH) f32
                             *, dropout_p, tok, rows, use_hw_prng):
    j = pl.program_id(0)            # hidden tile
    i = pl.program_id(1)            # token block

    widx = idx_ref[:, 0:1]                                      # (TOK, 1)
    cidx = idx_ref[:, 1:2]                                      # (TOK, 1) = V+pos
    iota = lax.broadcasted_iota(jnp.int32, (tok, rows), 1)
    twohot = ((iota == widx) | (iota == cidx)).astype(jnp.float32)
    twohot = twohot.astype(tab_ref.dtype)

    # One MXU pass does both lookups AND the word+pos add:
    # (TOK, ROWS) @ (ROWS, TH) -> (TOK, TH), f32 accumulation.
    x = jnp.dot(twohot, tab_ref[...], preferred_element_type=jnp.float32)

    if dropout_p > 0.0:
        x = _apply_dropout(x, dropout_p, seed_ref[0], i, j, use_hw_prng)

    out_ref[...] = x.astype(out_ref.dtype)


def _forward_matmul(params, widx, pidx, n, dropout_p, seed, use_hw_prng):
    tab = params["table"]                       # (ROWS, Hp) bf16, rows=[word;pos]
    rows, hp = tab.shape
    th = params["th"]
    n_h = hp // th
    tok = _choose_tok(n, params["tok_max"])
    n_pad = _round_up(n, tok)
    n_blocks = n_pad // tok

    # Pack [word_id, V + pos_id] -> one small DMA per token block.
    idx = jnp.stack([widx, pidx + params["vocab"]], axis=1).astype(jnp.int32)
    if n_pad != n:
        idx = jnp.pad(idx, ((0, n_pad - n), (0, 0)))
    seed_arr = jnp.array([seed], dtype=jnp.int32)

    kernel = functools.partial(
        _embedding_matmul_kernel, dropout_p=float(dropout_p), tok=tok,
        rows=rows, use_hw_prng=use_hw_prng)

    out = pl.pallas_call(
        kernel,
        out_shape=jax.ShapeDtypeStruct((n_pad, hp), jnp.float32),
        grid_spec=pltpu.PrefetchScalarGridSpec(
            num_scalar_prefetch=1,               # dropout seed
            grid=(n_h, n_blocks),                # h-tile outer, token blocks inner
            in_specs=[
                pl.BlockSpec((tok, 2), lambda j, i, seed: (i, 0)),
                # Constant over the inner (token) axis -> fetched only when the
                # h-tile changes, i.e. effectively VMEM-resident.
                # TODO(synk): pipeline_mode=pl.Buffered(1) would halve its VMEM.
                pl.BlockSpec((rows, th), lambda j, i, seed: (0, j)),
            ],
            out_specs=pl.BlockSpec((tok, th), lambda j, i, seed: (i, j)),
        ),
        compiler_params=pltpu.CompilerParams(
            dimension_semantics=("parallel", "parallel"),
            vmem_limit_bytes=params["vmem_cap"]),
    )(seed_arr, idx, tab)
    return out


# -----------------------------------------------------------------------------
# Path 2 (large tables): per-token async row gather from HBM.
# -----------------------------------------------------------------------------

def _embedding_gather_kernel(widx_ref, pidx_ref, seed_ref,     # SMEM (prefetch)
                             wtab_ref, ptab_ref,               # HBM (pl.ANY)
                             out_ref,                          # (TOK, Hp) f32
                             wbuf, pbuf, sem,                  # VMEM / DMA scratch
                             *, dropout_p, tok, use_hw_prng):
    blk = pl.program_id(0)
    base = blk * tok

    # Issue all 2*TOK row DMAs up front so they overlap each other.
    @pl.loop(0, tok)
    def _issue(t):
        w = widx_ref[base + t]
        p = pidx_ref[base + t]
        pltpu.make_async_copy(wtab_ref.at[w], wbuf.at[t], sem.at[0]).start()
        pltpu.make_async_copy(ptab_ref.at[p], pbuf.at[t], sem.at[1]).start()

    # Wait for all of them (every copy has the same byte count -> one sem each).
    @pl.loop(0, tok)
    def _wait(t):
        pltpu.make_async_copy(wtab_ref.at[0], wbuf.at[t], sem.at[0]).wait()
        pltpu.make_async_copy(ptab_ref.at[0], pbuf.at[t], sem.at[1]).wait()

    x = wbuf[...].astype(jnp.float32) + pbuf[...].astype(jnp.float32)
    if dropout_p > 0.0:
        x = _apply_dropout(x, dropout_p, seed_ref[0], blk, jnp.int32(0),
                           use_hw_prng)
    out_ref[...] = x.astype(out_ref.dtype)


def _forward_gather(params, widx, pidx, n, dropout_p, seed, use_hw_prng):
    wtab, ptab = params["wtab"], params["ptab"]        # (V, Hp), (P, Hp) in HBM
    hp = wtab.shape[1]
    tok = _choose_tok(n, params["tok_max"])
    n_pad = _round_up(n, tok)
    n_blocks = n_pad // tok

    if n_pad != n:
        widx = jnp.pad(widx, (0, n_pad - n))
        pidx = jnp.pad(pidx, (0, n_pad - n))
    seed_arr = jnp.array([seed], dtype=jnp.int32)

    kernel = functools.partial(
        _embedding_gather_kernel, dropout_p=float(dropout_p), tok=tok,
        use_hw_prng=use_hw_prng)

    out = pl.pallas_call(
        kernel,
        out_shape=jax.ShapeDtypeStruct((n_pad, hp), jnp.float32),
        grid_spec=pltpu.PrefetchScalarGridSpec(
            num_scalar_prefetch=3,                 # word ids, pos ids, seed
            grid=(n_blocks,),
            in_specs=[
                pl.BlockSpec(memory_space=pl.ANY),   # word table stays in HBM
                pl.BlockSpec(memory_space=pl.ANY),   # pos table stays in HBM
            ],
            out_specs=pl.BlockSpec((tok, hp), lambda i, w, p, s: (i, 0)),
            scratch_shapes=[
                pltpu.VMEM((tok, hp), wtab.dtype),
                pltpu.VMEM((tok, hp), ptab.dtype),
                pltpu.SemaphoreType.DMA((2,)),
            ]),
        compiler_params=pltpu.CompilerParams(
            dimension_semantics=("parallel",),
            vmem_limit_bytes=params["vmem_cap"]),
    )(widx.astype(jnp.int32), pidx.astype(jnp.int32), seed_arr, wtab, ptab)
    return out


# -----------------------------------------------------------------------------
# Public API: one-time parameter preparation + per-call forward.
# -----------------------------------------------------------------------------

def prepare_embedding(word_weight, pos_weight, *, force_path=None):
    """One-time prep (concat / pad / cast / path choice).  All table copies
    happen here, never in the per-call forward."""
    V, H = word_weight.shape
    P, Hc = pos_weight.shape
    assert Hc == H
    hp = _round_up(H, 128)

    kind = _device_kind()
    cap = _vmem_cap_bytes(kind)

    # Two-hot matmul wastes ~ROWS x FLOPs -> switch to DMA gather beyond a
    # small vocabulary (earlier on v5e whose MXU peak is ~4.7x lower).
    onehot_row_limit = 512 if "v5" in kind else 2048

    rows = V + P
    row_mult = 128 if ("v5" in kind or rows <= 128) else 256   # MXU depth
    rows_pad = _round_up(rows, row_mult)

    # Hidden tile (multiple of 128 that divides Hp) caps resident VMEM.
    if hp <= 512:
        th = hp
    else:
        th = next(c for c in (512, 384, 256, 128) if hp % c == 0)

    tok_mm = 256
    # VMEM estimate: bf16 table (2 bufs) + lane-padded id block + out block
    # (double-buffered) + in-kernel temporaries (two-hot/iota, x, random bits).
    mm_bytes = (2 * rows_pad * th * 2            # resident bf16 table, 2 buffers
                + 2 * tok_mm * 128 * 4           # packed ids block (lane padded)
                + 2 * tok_mm * th * 4            # output block
                + tok_mm * rows_pad * (4 + 2)    # iota + two-hot temporaries
                + 3 * tok_mm * th * 4)           # x / bits / keep temporaries
    mm_bytes += 2 << 20

    use_matmul = rows_pad <= onehot_row_limit and mm_bytes <= cap
    if force_path == "matmul":
        use_matmul = True
    elif force_path == "gather":
        use_matmul = False

    if use_matmul:
        # Small-table fast path: bf16 resident table (explicit precision choice:
        # single-pass MXU + half the VMEM; the gather path is the exact-f32 one).
        table = jnp.zeros((rows_pad, hp), jnp.bfloat16)
        table = table.at[:V, :H].set(word_weight.astype(jnp.bfloat16))
        table = table.at[V:V + P, :H].set(pos_weight.astype(jnp.bfloat16))
        return dict(path="matmul", table=table, vocab=V, h=H, hp=hp, th=th,
                    tok_max=tok_mm, vmem_cap=cap)

    # Gather path: tables stay in HBM (f32, exact); pad lanes only if needed.
    def _pad_h(w):
        w = w.astype(jnp.float32)
        return w if hp == H else jnp.pad(w, ((0, 0), (0, hp - H)))

    # Keep wbuf + pbuf + double-buffered output (~16 * TOK * Hp bytes) modest.
    budget = min(cap // 2, 24 << 20)
    tok_max = max(8, min(256, (budget // (16 * hp)) // 8 * 8))
    return dict(path="gather", wtab=_pad_h(word_weight), ptab=_pad_h(pos_weight),
                h=H, hp=hp, tok_max=tok_max, vmem_cap=cap)


def embedding_forward(params, input_indices, position_indices, *,
                      dropout_p=0.1, seed=0):
    """word_emb[idx] + pos_emb[pos_idx] followed by dropout -> (B, S, H) f32."""
    B, S = input_indices.shape
    n = B * S
    H, hp = params["h"], params["hp"]
    widx = input_indices.reshape(n).astype(jnp.int32)
    pidx = position_indices.reshape(n).astype(jnp.int32)
    use_hw_prng = jax.default_backend() == "tpu"

    if params["path"] == "matmul":
        out = _forward_matmul(params, widx, pidx, n, dropout_p, seed, use_hw_prng)
    else:
        out = _forward_gather(params, widx, pidx, n, dropout_p, seed, use_hw_prng)

    if out.shape[0] != n:
        out = out[:n]
    if hp != H:
        out = out[:, :H]
    return out.reshape(B, S, H)


def xavier_normal(key, shape, dtype=jnp.float32):
    fan_out, fan_in = shape   # (num_embeddings, embedding_dim), torch convention
    std = (2.0 / (fan_in + fan_out)) ** 0.5
    return std * jax.random.normal(key, shape, dtype=dtype)


if __name__ == "__main__":
    batch, seq = 2, 8
    hidden = 128
    vocab = 64
    max_seq_len = 16
    dropout_p = 0.1

    key = jax.random.PRNGKey(0)
    k_w, k_p, k_i = jax.random.split(key, 3)
    word_weight = xavier_normal(k_w, (vocab, hidden))
    pos_weight = xavier_normal(k_p, (max_seq_len, hidden))
    input_indices = jax.random.randint(k_i, (batch, seq), 0, vocab, dtype=jnp.int32)
    position_indices = jnp.broadcast_to(
        jnp.arange(seq, dtype=jnp.int32), (batch, seq))

    ref_exact = word_weight[input_indices] + pos_weight[position_indices]
    ref_bf16 = (word_weight.astype(jnp.bfloat16).astype(jnp.float32)[input_indices]
                + pos_weight.astype(jnp.bfloat16).astype(jnp.float32)[position_indices])

    # Exercise both paths at small shapes.
    for path, ref, tol in (
        ("matmul", ref_bf16, dict(rtol=1e-4, atol=1e-5)),   # bf16 fast path
        ("gather", ref_exact, dict(rtol=1e-6, atol=1e-7)),  # exact f32 path
    ):
        params = prepare_embedding(word_weight, pos_weight, force_path=path)
        assert params["path"] == path

        # Dropout disabled: must reproduce the plain lookup.
        out0 = embedding_forward(params, input_indices, position_indices,
                                 dropout_p=0.0, seed=0)
        jax.block_until_ready(out0)
        assert out0.shape == (batch, seq, hidden) and out0.dtype == jnp.float32
        assert jnp.allclose(out0, ref, **tol), f"{path}: mismatch vs reference"
        assert jnp.allclose(out0, ref_exact, rtol=2e-2, atol=4e-3), \
            f"{path}: too far from exact f32 reference"

        # Dropout enabled: every element is either exactly 0 or ~ ref/(1-p).
        out = embedding_forward(params, input_indices, position_indices,
                                dropout_p=dropout_p, seed=123)
        jax.block_until_ready(out)
        assert bool(jnp.isfinite(out).all())
        scaled = ref / (1.0 - dropout_p)
        ok = jnp.where(out == 0.0, True,
                       jnp.isclose(out, scaled, rtol=1e-3, atol=1e-4))
        assert bool(ok.all()), f"{path}: dropout output is not a zeroed/scaled lookup"
        drop_frac = float(jnp.mean((out == 0.0).astype(jnp.float32)))
        assert 0.02 < drop_frac < 0.30, f"{path}: unexpected drop fraction {drop_frac}"

    # Default dispatch at these tiny shapes picks the resident-table matmul path.
    assert prepare_embedding(word_weight, pos_weight)["path"] == "matmul"

    print("KERNEL_OK")
</pallas_src>

<mosaic_0001>
module attributes {stable_mosaic.version = 11 : i64} {
  func.func @_embedding_matmul_kernel(%arg0: i32, %arg1: i32, %arg2: memref<1xi32, #tpu.memory_space<smem>>, %arg3: memref<8x2xi32, #tpu.memory_space<vmem>>, %arg4: memref<128x128xbf16, #tpu.memory_space<vmem>>, %arg5: memref<8x128xf32, #tpu.memory_space<vmem>>) attributes {dimension_semantics = [#tpu.dimension_semantics<parallel>, #tpu.dimension_semantics<parallel>], iteration_bounds = array<i64: 1, 2>, scalar_prefetch = 1 : i64, scratch_operands = 0 : i64, tpu.core_type = #tpu.core_type<tc>, window_params = [{transform_indices = @transform_0, window_bounds = array<i64: 8, 2>}, {transform_indices = @transform_1, window_bounds = array<i64: 128, 128>}, {transform_indices = @transform_2, window_bounds = array<i64: 8, 128>}]} {
    %c0 = arith.constant 0 : index
    %c0_0 = arith.constant 0 : index
    %0 = vector.load %arg3[%c0, %c0_0] : memref<8x2xi32, #tpu.memory_space<vmem>>, vector<8x1xi32>
    %c0_1 = arith.constant 0 : index
    %c1 = arith.constant 1 : index
    %1 = vector.load %arg3[%c0_1, %c1] : memref<8x2xi32, #tpu.memory_space<vmem>>, vector<8x1xi32>
    %2 = tpu.iota {dimensions = array<i32: 1>} : vector<8x128xi32>
    %3 = vector.broadcast %0 : vector<8x1xi32> to vector<8x128xi32>
    %4 = arith.cmpi eq, %2, %3 : vector<8x128xi32>
    %5 = vector.broadcast %1 : vector<8x1xi32> to vector<8x128xi32>
    %6 = arith.cmpi eq, %2, %5 : vector<8x128xi32>
    %7 = arith.ori %4, %6 : vector<8x128xi1>
    %8 = arith.extui %7 : vector<8x128xi1> to vector<8x128xi32>
    %9 = arith.sitofp %8 : vector<8x128xi32> to vector<8x128xf32>
    %10 = arith.truncf %9 : vector<8x128xf32> to vector<8x128xbf16>
    %c0_2 = arith.constant 0 : index
    %c0_3 = arith.constant 0 : index
    %11 = vector.load %arg4[%c0_2, %c0_3] : memref<128x128xbf16, #tpu.memory_space<vmem>>, vector<128x128xbf16>
    %cst = arith.constant dense<0.000000e+00> : vector<8x128xf32>
    %12 = tpu.matmul %10, %11, %cst {dimension_numbers = #tpu.dot_dimension_numbers<[1], [0], [0], [1], [0, 0, 1, 1], [], []>} : vector<8x128xbf16>, vector<128x128xbf16>, vector<8x128xf32> -> vector<8x128xf32>
    %c0_4 = arith.constant 0 : index
    %c0_5 = arith.constant 0 : index
    %13 = vector.load %arg5[%c0_4, %c0_5] : memref<8x128xf32, #tpu.memory_space<vmem>>, vector<8x128xf32>
    tpu.vector_store %arg5[%c0_4, %c0_5], %12 {strides = array<i32>} : memref<8x128xf32, #tpu.memory_space<vmem>>, vector<8x128xf32>,
    return
  }
  func.func @transform_0(%arg0: i32, %arg1: i32, %arg2: memref<1xi32, #tpu.memory_space<smem>>) -> (i32, i32) {
    %c0_i32 = arith.constant 0 : i32
    %c0_i32_0 = arith.constant 0 : i32
    return %arg1, %c0_i32 : i32, i32
  }
  func.func @transform_1(%arg0: i32, %arg1: i32, %arg2: memref<1xi32, #tpu.memory_space<smem>>) -> (i32, i32) {
    %c0_i32 = arith.constant 0 : i32
    %c0_i32_0 = arith.constant 0 : i32
    return %c0_i32, %arg0 : i32, i32
  }
  func.func @transform_2(%arg0: i32, %arg1: i32, %arg2: memref<1xi32, #tpu.memory_space<smem>>) -> (i32, i32) {
    %c0_i32 = arith.constant 0 : i32
    return %arg1, %arg0 : i32, i32
  }
}

</mosaic_0001>

<bundles_post_ra>
// kernel: tpu_custom_call.1
= control target key start
LH: loop header
LB: loop body
LE: loop exit
PB: predicated region body
PF: predicated region fallthrough
CT: control target
= control target key end

     0   :  { %9 = vsyncpa [#allocation5], 0  ;;  %s740_s0 = inlined_call_operand.<no memory space> [shape: s32[1], index: 0, kind: input, shape index: {}]   ;;  %s741_s1 = inlined_call_operand.vmem [shape: s32[16,2], index: 1, kind: input, shape index: {}]   ;;  %s742_s2 = inlined_call_operand.hbm [shape: bf16[128,128], index: 2, kind: input, shape index: {}]   ;;  %s743_s3 = inlined_call_operand.hbm [shape: f32[16,128], index: 3, kind: output, shape index: {}]  }
   0x1   :  { %10 = vsyncpa [#allocation6], 0 }
   0x2   :  { %12 = vsyncpa [#allocation6 + $0x1], 0  ;;  %s640_s12 = smov 0   ;;  %s642_s13 = smov 0  }
   0x3   :  { %s644_s14 = smov 0   ;;  %s646_s15 = smov 0  }
   0x4   :  { %s648_s0 = smov 0   ;;  %s650_s16 = smov 0  }
   0x5 LB: > { %s371_s17 = sadd.s32 4294967295, %s612_s16   ;;  %s372_s18 = sadd.s32 4294967294, %s612_s16   ;;  %s612_s16 = sphi %s650_s16, %s18_s16   ;;  %s608_s0 = sphi %s648_s0, %s750_s0   ;;  %s604_s15 = sphi %s646_s15, %s749_s15   ;;  %s600_s14 = sphi %s644_s14, %s748_s14   ;;  %s596_s13 = sphi %s642_s13, %s747_s13   ;;  %s592_s12 = sphi %s640_s12, %s746_s12  }
   0x6   : > { %s27_s19 = sadd.s32 1, %s608_s0  ;;  %s91_s20 = sadd.s32 1, %s600_s14 }
   0x7   : > { %p28_p0 = scmp.ge.s32.totalorder %s27_s19, 2  ;;  %p101_p1 = scmp.ne.s32.totalorder %s600_s14, %s596_s13 }
   0x8   : > { %p102_p2 = scmp.eq.s32.totalorder %s371_s17, 1  ;;  %p107_p3 = scmp.ne.s32.totalorder %s596_s13, %s592_s12 }
   0x9   : > { %s752_s19 = smov (%p28_p0, %s27_s19), 0  ;;  %p108_p5 = scmp.eq.s32.totalorder %s372_s18, 1 }
   0xa   : > { %p680_p4 = por %p102_p2, %p101_p1  ;;  %s86_s22 = ssub.s32 %s608_s0, %s752_s19 }
   0xb   : > { %p373_p6 = scmp.ge.s32.totalorder %s612_s16, 1  ;;  %p89_p7 = scmp.eq.s32.totalorder %s86_s22, 0 }
   0xc   : > { %p687_p8 = por %p108_p5, %p107_p3  ;;  %p115_p9 = scmp.lt.s32.totalorder %s612_s16, 3 }
   0xd   : > { %s693_s24 = scalar_select %p89_p7, %s600_s14, %s91_s20  }
   0xe   : > { %p116_p10 = pnand %p373_p6, %p115_p9  ;;  %p441_p11 = scmp.eq.s32.totalorder %s371_s17, 0 }
   0xf   : > { %s128_s27 = sshll.u32 %s742_s2, 4  ;;  %s614_s28 = smov [#allocation4]   ;;  %s129_s27 = int_to_ptr.hbm [resolvable:$true] %s128_s27 }
  0x10   : > { %p433_p12 = pneg %p116_p10  ;;  %s130_s29 = sshll.u32 %s614_s28, 4  ;;  %s131_s29 = int_to_ptr.vmem [resolvable:$true] %s130_s29 }
  0x11   : > { %s615_s30 = smov 64   ;;  %s616_s4 = smov 4  }
  0x12   : > { %p434_p13 = pnand %p441_p11, %p433_p12  ;;  %153 = sbr.rel (%p116_p10) target bundleno = 292 (0x124), region = 28 }
  0x14   : > { %436 = dma.hbm_to_vmem [thread:$0]  (!%p434_p13), %s129_s27, 1024, %s131_s29, [#allocation5], %s615_s30, %s615_s30, %s616_s4  }
  0x17   : > { %583 = dma.done.wait (%p441_p11), [#allocation5], 1024  }
  0x18   : > { %585 = vsyncadd (%p441_p11), [#allocation5], 4294966272  ;;  %p175_p0 = scmp.lt.s32.totalorder %s604_s15, 1  ;;  %v617_v0 = vmov 0   ;;  %v426_v2 = vld [vmem:[#allocation4 + $0x38] sm:$0xff]  ;;  %v425_v3 = vld [vmem:[#allocation4 + $0x30] sm:$0xff]  ;;  %v180_v12 = vlaneseq }
  0x19   : > { %498 = vset.pattern.permute.xlu0 %v617_v0  ;;  %258 = vmatpush.bf16.msra.mxu0 %v426_v2  ;;  %v424_v4 = vld [vmem:[#allocation4 + $0x28] sm:$0xff]  ;;  %v618_v5 = vmov 1   ;;  %v423_v6 = vld [vmem:[#allocation4 + $0x20] sm:$0xff]  ;;  %v422_v7 = vld [vmem:[#allocation4 + $0x18] sm:$0xff]  ;;  %v619_v15 = vmov 1.0|1.0  }
  0x1a   : > { %s176_s5 = scalar_select %p175_p0, %s604_s15, 1  ;;  %v421_v8 = vld [vmem:[#allocation4 + $0x10] sm:$0xff]  ;;  %v420_v9 = vld [vmem:[#allocation4 + $0x8] sm:$0xff]  ;;  %v419_v10 = vld [vmem:[#allocation4] sm:$0xff]  ;;  %v181_v13 = vand.u32 127, %v180_v12 }
  0x1b   : > { %s172_s10 = sand.u32 1, %s596_s13   ;;  %s416_s11 = sshll.u32 %s604_s15, 3 }
  0x1c   : > { %s379_s6 = sshll.u32 %s176_s5, 3  ;;  %s378_s17 = sshll.u32 %s172_s10, 3 }
  0x1d   : > { %s178_s9 = scalar_lea.vmem %s741_s1, %s379_s6  ;;  %259 = vmatpush.bf16.msra.mxu0 %v425_v3  ;;  %s284_s22 = scalar_lea.hbm %s743_s3, %s416_s11 }
  0x1e   : > { %v179_v1 = vld [vmem:[%s178_s9] sm:$0xff]  ;;  %s174_s25 = scalar_lea.vmem [#allocation7], %s378_s17  ;;  %s288_s27 = sshll.u32 %s284_s22, 4  ;;  %s289_s27 = int_to_ptr.hbm [resolvable:$true] %s288_s27 }
  0x1f   : > { %183 = vperm.xlu0 %498, %v179_v1   ;;  %s286_s26 = sshll.u32 %s174_s25, 4  ;;  %s273_s28 = scalar_lea.sflag [#allocation6], %s172_s10  ;;  %s287_s26 = int_to_ptr.vmem [resolvable:$true] %s286_s26 }
  0x20   : > { %s544_s29 = sshra.s32 %s289_s27, 4  ;;  %s550_s5 = scalar_lea.hbm %s743_s3, 16  ;;  %s545_s29 = int_to_ptr.hbm [resolvable:$true] %s544_s29 }
  0x21   : > { %260 = vmatpush.bf16.msra.mxu0 %v424_v4  ;;  %s546_s30 = scalar_lea.hbm %s545_s29, 8  ;;  %p551_p5 = scmp.lt.s32.totalorder %s545_s29, %s743_s3 }
  0x22   : > { %p547_p1 = scmp.ne.s32.totalorder %s545_s29, %s546_s30  ;;  %p552_p6 = scmp.lt.s32.totalorder %s550_s5, %s546_s30 }
  0x24   : > { %p548_p2 = pnand %p547_p1, %p680_p4  ;;  %p553_p7 = por %p552_p6, %p551_p5 }
  0x25   : > { %261 = vmatpush.bf16.msra.mxu0 %v423_v6 }
  0x26   : > { %p549_p3 = pneg %p548_p2 }
  0x27   : > { %499 = vset.pattern.permute.xlu0 %v618_v5 }
  0x28   : > { %187 = vperm.xlu0 %499, %v179_v1   ;;  %p554_p9 = pnand %p553_p7, %p549_p3 }
  0x29   : > { %262 = vmatpush.bf16.msra.mxu0 %v422_v7 }
  0x2d   : > { %263 = vmatpush.bf16.msra.mxu0 %v421_v8 }
  0x31   : > { %264 = vmatpush.bf16.msra.mxu0 %v420_v9 }
  0x35   : > { %265 = vmatpush.bf16.msra.mxu0 %v419_v10 }
  0x91   : > { %v184_v11 = vpop.permute.xlu0 %183 }
  0x92   : > { %vm185_vm0 = vcmp.eq.s32.totalorder %v181_v13, %v184_v11 }
  0x9a   : > { %v188_v14 = vpop.permute.xlu0 %187 }
  0x9b   : > { %vm189_vm1 = vcmp.eq.s32.totalorder %v181_v13, %v188_v14 }
  0x9c   : > { %vm190_vm2 = vmor %vm185_vm0, %vm189_vm1 }
  0x9d   : > { %vm413_vm3 = vmpackc.low %vm190_vm2, %vm190_vm2 }
  0x9e   : > { %414 = vmatmul.msk.bf16.vlgmr.msra.gmra.mxu0 %vm413_vm3, %v619_v15 }
 0x11b   : > { %v267_v16 = vpop.f32.mrf.mxu0 }
 0x11c   : > { %271 = vst [vmem:[%s174_s25] sm:$0xff] %v267_v16 }
 0x11d   : > { %557 = shalt.err (!%p554_p9)
}
 0x11e   : > { %431 = dma.vmem_to_hbm [thread:$0]  (%p680_p4), %s287_s26, 128, %s289_s27, %s273_s28  }
 0x123   : > { %v269_v17 = vpop.f32.mrf.mxu0 }
 0x124 PF: > { %p443_p10 = scmp.ge.s32.totalorder %s612_s16, 2  ;;  %s300_s8 = sand.u32 1, %s592_s12  }
 0x125   : > { %s301_s9 = scalar_lea.sflag [#allocation6], %s300_s8 }
 0x126   : > { %p438_p11 = pnand %p443_p10, %p687_p8 }
 0x128   : > { %p439_p12 = pneg %p438_p11 }
 0x12a   : > { %587 = dma.done.wait (%p439_p12), %s301_s9, 128  }
 0x12b   : > { %589 = vsyncadd (%p439_p12), %s301_s9, 4294967168  ;;  %s18_s16 = sadd.s32 1, %s612_s16   ;;  %s746_s12 = smov %s596_s13 }
 0x12c   : > { %p15_p13 = scmp.ge.s32.totalorder %s18_s16, 4   ;;  %s747_s13 = smov %s600_s14 }
 0x12d   : > { %s748_s14 = smov %s693_s24  ;;  %s749_s15 = smov %s608_s0 }
 0x12e   : > { %s750_s0 = smov %s752_s19  ;;  %17 = sbr.rel (!%p15_p13) target bundleno = 5 (0x5), region = 69 }
 0x133   :  { %307 = vsyncpa [#allocation5], 1 }
 0x134   :  { %309 = vsyncpa [#allocation5 + $0x1], 1 }
 0x135   :  { %310 = vsyncpa [#allocation6], 1 }
 0x136   :  { %312 = vsyncpa [#allocation6 + $0x1], 1 }

</bundles_post_ra>
